<compile_context>
chip_gen: v5e
topology: v5e:2x2
jax: 0.10.0
libtpu: 0.0.40
codegen_flags: <defaults>
</compile_context>

<pallas_src>
import jax
import jax.numpy as jnp
from jax.experimental import pallas as pl
from jax.experimental.pallas import tpu as pltpu

PAD_IN = 16          # input features padded 14 -> 16 (aligned K for layer 1)

# Dropout layers (p=0.4/0.3) are identity in eval mode -> intentionally omitted.


# ----------------------------------------------------------------------------
# Kernel: one batch tile of TILE_B rows.
#   x_ref : (TILE_B, PAD_IN) f32   (natural row-major input layout)
#   w1    : (128, PAD_IN)    f32   (PyTorch (out, in) layout, K padded to 16)
#   w2..w5: (out, in)        f32
#   w6    : (16, 1)          f32   (VPU path, not MXU)
#   b1..b6: (out, 1)         f32
#   out   : (1, TILE_B)      f32   (lane-dense row of sigmoid outputs)
# ----------------------------------------------------------------------------
def mlp_kernel(x_ref,
               w1_ref, b1_ref,
               w2_ref, b2_ref,
               w3_ref, b3_ref,
               w4_ref, b4_ref,
               w5_ref, b5_ref,
               w6_ref, b6_ref,
               out_ref):
    # Layer 1: contract x's last (feature) dim directly -> (128, TILE_B).
    # This puts the batch on the lane dimension for the whole network without
    # an explicit transpose pass in the wrapper.
    h = jax.lax.dot_general(
        w1_ref[...], x_ref[...],
        dimension_numbers=(((1,), (1,)), ((), ())),
        preferred_element_type=jnp.float32)
    h = jnp.maximum(h + b1_ref[...], 0.0)            # bias (out,1) broadcasts over lanes

    def layer(h, w_ref, b_ref):
        y = jnp.dot(w_ref[...], h, preferred_element_type=jnp.float32)
        return jnp.maximum(y + b_ref[...], 0.0)      # ReLU (Dropout = identity in eval)

    h = layer(h, w2_ref, b2_ref)                     # (96,  T)
    h = layer(h, w3_ref, b3_ref)                     # (64,  T)
    h = layer(h, w4_ref, b4_ref)                     # (32,  T)
    h = layer(h, w5_ref, b5_ref)                     # (16,  T)

    # Final Linear(16 -> 1): VPU multiply + sublane (XLU) reduce instead of a
    # tiny N=1 MXU matmul.
    logits = jnp.sum(h * w6_ref[...], axis=0, keepdims=True) + b6_ref[...]   # (1, T)
    out_ref[...] = jax.nn.sigmoid(logits)            # lane-dense (1, T) store


# ----------------------------------------------------------------------------
# Batch-tile chooser: multiples of 128, capped at 4096 (VMEM-safe in f32 on
# v5e/v6e/v7x), and >= 2 grid steps for B >= 256 so the "parallel" grid axis
# can be sharded across both v7x TensorCores.
# ----------------------------------------------------------------------------
def _choose_tile_b(batch):
    cap = 4096
    if batch <= 256:
        return 128
    half = (batch // 2 // 128) * 128                 # round_down(B/2, 128)
    return max(128, min(cap, half))


# ----------------------------------------------------------------------------
# One-time parameter preparation (hoisted out of the per-call forward):
#   layers 1-5 weights -> (out, in) f32 (layer-1 K padded 14 -> 16),
#   layer 6 weight     -> (16, 1) f32 column for the VPU path,
#   biases             -> (out, 1) f32 columns.
# ----------------------------------------------------------------------------
def prepare_params(params):
    flat = []
    for li, (w, b) in enumerate(params):
        if li < 5:
            w_t = jnp.asarray(w, jnp.float32).T                       # (out, in)
            if li == 0:
                w_t = jnp.pad(w_t, ((0, 0), (0, PAD_IN - w_t.shape[1])))
            flat.append(w_t)
        else:
            flat.append(jnp.asarray(w, jnp.float32))                  # (16, 1)
        flat.append(jnp.asarray(b, jnp.float32).reshape(-1, 1))       # (out, 1)
    return tuple(flat)


# ----------------------------------------------------------------------------
# Forward: pads the batch (and features 14 -> 16) in one jnp.pad, tiles the
# batch over a 1-D grid, keeps all weights/biases VMEM-resident via constant
# index_maps.
# ----------------------------------------------------------------------------
@jax.jit
def race_predictor_forward(x, flat_params):
    B, F = x.shape
    tile_b = _choose_tile_b(B)
    num_tiles = pl.cdiv(B, tile_b)
    b_padded = num_tiles * tile_b

    # Single pad (zero-fill) for batch + feature alignment; no transpose/cast.
    x_p = jnp.pad(x.astype(jnp.float32), ((0, b_padded - B), (0, PAD_IN - F)))

    in_specs = [pl.BlockSpec((tile_b, PAD_IN), lambda i: (i, 0))]
    for arr in flat_params:
        in_specs.append(pl.BlockSpec(arr.shape, lambda i: (0, 0)))

    out = pl.pallas_call(
        mlp_kernel,
        out_shape=jax.ShapeDtypeStruct((1, b_padded), jnp.float32),
        grid=(num_tiles,),
        in_specs=in_specs,
        out_specs=pl.BlockSpec((1, tile_b), lambda i: (0, i)),
        compiler_params=pltpu.CompilerParams(
            dimension_semantics=("parallel",)),
    )(x_p, *flat_params)

    # Drop batch padding; match PyTorch's .squeeze() (scalar when B == 1).
    return jnp.squeeze(out[0, :B])


# ----------------------------------------------------------------------------
# Deterministic parameter init (same shapes/scheme as torch.nn.Linear default).
# ----------------------------------------------------------------------------
def init_params(key, input_size=14):
    sizes = [input_size, 128, 96, 64, 32, 16, 1]
    params = []
    for i in range(len(sizes) - 1):
        fan_in, fan_out = sizes[i], sizes[i + 1]
        key, kw, kb = jax.random.split(key, 3)
        bound = 1.0 / jnp.sqrt(fan_in)
        w = jax.random.uniform(kw, (fan_in, fan_out), jnp.float32, -bound, bound)
        b = jax.random.uniform(kb, (1, fan_out), jnp.float32, -bound, bound)
        params.append((w, b))
    return params


# ----------------------------------------------------------------------------
# Pure-JAX f32 reference for a sanity check.
# ----------------------------------------------------------------------------
def reference_forward(x, params):
    h = x
    for i, (w, b) in enumerate(params):
        h = h @ w + b
        if i < len(params) - 1:
            h = jnp.maximum(h, 0.0)
        else:
            h = jax.nn.sigmoid(h)
    return jnp.squeeze(h)


if __name__ == "__main__":
    key = jax.random.PRNGKey(0)
    key, kx = jax.random.split(key)

    B, F = 16, 14
    x = jax.random.normal(kx, (B, F), jnp.float32)
    params = init_params(key, input_size=F)
    flat_params = prepare_params(params)

    out = jax.block_until_ready(race_predictor_forward(x, flat_params))
    ref = reference_forward(x, params)

    assert out.shape == (B,), out.shape
    # Full f32 pipeline; small tolerance covers matmul pass-order differences.
    assert jnp.allclose(out, ref, atol=2e-3, rtol=0.0), (out, ref)

    print("KERNEL_OK")
</pallas_src>

<mosaic_0001>
module attributes {stable_mosaic.version = 11 : i64} {
  func.func @mlp_kernel(%arg0: i32, %arg1: memref<128x16xf32, #tpu.memory_space<vmem>>, %arg2: memref<128x16xf32, #tpu.memory_space<vmem>>, %arg3: memref<128x1xf32, #tpu.memory_space<vmem>>, %arg4: memref<96x128xf32, #tpu.memory_space<vmem>>, %arg5: memref<96x1xf32, #tpu.memory_space<vmem>>, %arg6: memref<64x96xf32, #tpu.memory_space<vmem>>, %arg7: memref<64x1xf32, #tpu.memory_space<vmem>>, %arg8: memref<32x64xf32, #tpu.memory_space<vmem>>, %arg9: memref<32x1xf32, #tpu.memory_space<vmem>>, %arg10: memref<16x32xf32, #tpu.memory_space<vmem>>, %arg11: memref<16x1xf32, #tpu.memory_space<vmem>>, %arg12: memref<16x1xf32, #tpu.memory_space<vmem>>, %arg13: memref<1x1xf32, #tpu.memory_space<vmem>>, %arg14: memref<1x128xf32, #tpu.memory_space<vmem>>) attributes {dimension_semantics = [#tpu.dimension_semantics<parallel>], iteration_bounds = array<i64: 1>, scalar_prefetch = 0 : i64, scratch_operands = 0 : i64, tpu.core_type = #tpu.core_type<tc>, window_params = [{transform_indices = @transform_0, window_bounds = array<i64: 128, 16>}, {pipeline_mode = #tpu.pipeline_mode<synchronous>, transform_indices = @transform_1, window_bounds = array<i64: 128, 16>}, {pipeline_mode = #tpu.pipeline_mode<synchronous>, transform_indices = @transform_2, window_bounds = array<i64: 128, 1>}, {pipeline_mode = #tpu.pipeline_mode<synchronous>, transform_indices = @transform_3, window_bounds = array<i64: 96, 128>}, {pipeline_mode = #tpu.pipeline_mode<synchronous>, transform_indices = @transform_4, window_bounds = array<i64: 96, 1>}, {pipeline_mode = #tpu.pipeline_mode<synchronous>, transform_indices = @transform_5, window_bounds = array<i64: 64, 96>}, {pipeline_mode = #tpu.pipeline_mode<synchronous>, transform_indices = @transform_6, window_bounds = array<i64: 64, 1>}, {pipeline_mode = #tpu.pipeline_mode<synchronous>, transform_indices = @transform_7, window_bounds = array<i64: 32, 64>}, {pipeline_mode = #tpu.pipeline_mode<synchronous>, transform_indices = @transform_8, window_bounds = array<i64: 32, 1>}, {pipeline_mode = #tpu.pipeline_mode<synchronous>, transform_indices = @transform_9, window_bounds = array<i64: 16, 32>}, {pipeline_mode = #tpu.pipeline_mode<synchronous>, transform_indices = @transform_10, window_bounds = array<i64: 16, 1>}, {pipeline_mode = #tpu.pipeline_mode<synchronous>, transform_indices = @transform_11, window_bounds = array<i64: 16, 1>}, {pipeline_mode = #tpu.pipeline_mode<synchronous>, transform_indices = @transform_12, window_bounds = array<i64: 1, 1>}, {transform_indices = @transform_13, window_bounds = array<i64: 1, 128>}]} {
    %c0 = arith.constant 0 : index
    %c0_0 = arith.constant 0 : index
    %0 = vector.load %arg2[%c0, %c0_0] : memref<128x16xf32, #tpu.memory_space<vmem>>, vector<128x16xf32>
    %c0_1 = arith.constant 0 : index
    %c0_2 = arith.constant 0 : index
    %1 = vector.load %arg1[%c0_1, %c0_2] : memref<128x16xf32, #tpu.memory_space<vmem>>, vector<128x16xf32>
    %cst = arith.constant dense<0.000000e+00> : vector<128x128xf32>
    %2 = tpu.matmul %0, %1, %cst {dimension_numbers = #tpu.dot_dimension_numbers<[1], [1], [0], [0], [0, 0, 1, 0], [], []>} : vector<128x16xf32>, vector<128x16xf32>, vector<128x128xf32> -> vector<128x128xf32>
    %c0_3 = arith.constant 0 : index
    %c0_4 = arith.constant 0 : index
    %3 = vector.load %arg3[%c0_3, %c0_4] : memref<128x1xf32, #tpu.memory_space<vmem>>, vector<128x1xf32>
    %4 = vector.broadcast %3 : vector<128x1xf32> to vector<128x128xf32>
    %5 = arith.addf %2, %4 : vector<128x128xf32>
    %cst_5 = arith.constant 0.000000e+00 : f32
    %6 = vector.broadcast %cst_5 : f32 to vector<128x128xf32>
    %7 = arith.maximumf %5, %6 : vector<128x128xf32>
    %c0_6 = arith.constant 0 : index
    %c0_7 = arith.constant 0 : index
    %8 = vector.load %arg4[%c0_6, %c0_7] : memref<96x128xf32, #tpu.memory_space<vmem>>, vector<96x128xf32>
    %cst_8 = arith.constant dense<0.000000e+00> : vector<96x128xf32>
    %9 = tpu.matmul %8, %7, %cst_8 {dimension_numbers = #tpu.dot_dimension_numbers<[1], [0], [0], [1], [0, 0, 1, 1], [], []>} : vector<96x128xf32>, vector<128x128xf32>, vector<96x128xf32> -> vector<96x128xf32>
    %c0_9 = arith.constant 0 : index
    %c0_10 = arith.constant 0 : index
    %10 = vector.load %arg5[%c0_9, %c0_10] : memref<96x1xf32, #tpu.memory_space<vmem>>, vector<96x1xf32>
    %11 = vector.broadcast %10 : vector<96x1xf32> to vector<96x128xf32>
    %12 = arith.addf %9, %11 : vector<96x128xf32>
    %cst_11 = arith.constant 0.000000e+00 : f32
    %13 = vector.broadcast %cst_11 : f32 to vector<96x128xf32>
    %14 = arith.maximumf %12, %13 : vector<96x128xf32>
    %c0_12 = arith.constant 0 : index
    %c0_13 = arith.constant 0 : index
    %15 = vector.load %arg6[%c0_12, %c0_13] : memref<64x96xf32, #tpu.memory_space<vmem>>, vector<64x96xf32>
    %cst_14 = arith.constant dense<0.000000e+00> : vector<64x128xf32>
    %16 = tpu.matmul %15, %14, %cst_14 {dimension_numbers = #tpu.dot_dimension_numbers<[1], [0], [0], [1], [0, 0, 1, 1], [], []>} : vector<64x96xf32>, vector<96x128xf32>, vector<64x128xf32> -> vector<64x128xf32>
    %c0_15 = arith.constant 0 : index
    %c0_16 = arith.constant 0 : index
    %17 = vector.load %arg7[%c0_15, %c0_16] : memref<64x1xf32, #tpu.memory_space<vmem>>, vector<64x1xf32>
    %18 = vector.broadcast %17 : vector<64x1xf32> to vector<64x128xf32>
    %19 = arith.addf %16, %18 : vector<64x128xf32>
    %cst_17 = arith.constant 0.000000e+00 : f32
    %20 = vector.broadcast %cst_17 : f32 to vector<64x128xf32>
    %21 = arith.maximumf %19, %20 : vector<64x128xf32>
    %c0_18 = arith.constant 0 : index
    %c0_19 = arith.constant 0 : index
    %22 = vector.load %arg8[%c0_18, %c0_19] : memref<32x64xf32, #tpu.memory_space<vmem>>, vector<32x64xf32>
    %cst_20 = arith.constant dense<0.000000e+00> : vector<32x128xf32>
    %23 = tpu.matmul %22, %21, %cst_20 {dimension_numbers = #tpu.dot_dimension_numbers<[1], [0], [0], [1], [0, 0, 1, 1], [], []>} : vector<32x64xf32>, vector<64x128xf32>, vector<32x128xf32> -> vector<32x128xf32>
    %c0_21 = arith.constant 0 : index
    %c0_22 = arith.constant 0 : index
    %24 = vector.load %arg9[%c0_21, %c0_22] : memref<32x1xf32, #tpu.memory_space<vmem>>, vector<32x1xf32>
    %25 = vector.broadcast %24 : vector<32x1xf32> to vector<32x128xf32>
    %26 = arith.addf %23, %25 : vector<32x128xf32>
    %cst_23 = arith.constant 0.000000e+00 : f32
    %27 = vector.broadcast %cst_23 : f32 to vector<32x128xf32>
    %28 = arith.maximumf %26, %27 : vector<32x128xf32>
    %c0_24 = arith.constant 0 : index
    %c0_25 = arith.constant 0 : index
    %29 = vector.load %arg10[%c0_24, %c0_25] : memref<16x32xf32, #tpu.memory_space<vmem>>, vector<16x32xf32>
    %cst_26 = arith.constant dense<0.000000e+00> : vector<16x128xf32>
    %30 = tpu.matmul %29, %28, %cst_26 {dimension_numbers = #tpu.dot_dimension_numbers<[1], [0], [0], [1], [0, 0, 1, 1], [], []>} : vector<16x32xf32>, vector<32x128xf32>, vector<16x128xf32> -> vector<16x128xf32>
    %c0_27 = arith.constant 0 : index
    %c0_28 = arith.constant 0 : index
    %31 = vector.load %arg11[%c0_27, %c0_28] : memref<16x1xf32, #tpu.memory_space<vmem>>, vector<16x1xf32>
    %32 = vector.broadcast %31 : vector<16x1xf32> to vector<16x128xf32>
    %33 = arith.addf %30, %32 : vector<16x128xf32>
    %cst_29 = arith.constant 0.000000e+00 : f32
    %34 = vector.broadcast %cst_29 : f32 to vector<16x128xf32>
    %35 = arith.maximumf %33, %34 : vector<16x128xf32>
    %c0_30 = arith.constant 0 : index
    %c0_31 = arith.constant 0 : index
    %36 = vector.load %arg12[%c0_30, %c0_31] : memref<16x1xf32, #tpu.memory_space<vmem>>, vector<16x1xf32>
    %37 = vector.broadcast %36 : vector<16x1xf32> to vector<16x128xf32>
    %38 = arith.mulf %35, %37 : vector<16x128xf32>
    %cst_32 = arith.constant dense<0.000000e+00> : vector<128xf32>
    %39 = vector.multi_reduction <add>, %38, %cst_32 [0] : vector<16x128xf32> to vector<128xf32>
    %40 = vector.shape_cast %39 : vector<128xf32> to vector<1x128xf32>
    %c0_33 = arith.constant 0 : index
    %c0_34 = arith.constant 0 : index
    %41 = vector.load %arg13[%c0_33, %c0_34] : memref<1x1xf32, #tpu.memory_space<vmem>>, vector<1x1xf32>
    %42 = vector.broadcast %41 : vector<1x1xf32> to vector<1x128xf32>
    %43 = arith.addf %40, %42 : vector<1x128xf32>
    %44 = arith.negf %43 : vector<1x128xf32>
    %45 = math.exp %44 : vector<1x128xf32>
    %cst_35 = arith.constant 1.000000e+00 : f32
    %46 = vector.broadcast %cst_35 : f32 to vector<1x128xf32>
    %47 = arith.addf %46, %45 : vector<1x128xf32>
    %48 = arith.divf %46, %47 : vector<1x128xf32>
    %c0_36 = arith.constant 0 : index
    %c0_37 = arith.constant 0 : index
    %49 = vector.load %arg14[%c0_36, %c0_37] : memref<1x128xf32, #tpu.memory_space<vmem>>, vector<1x128xf32>
    tpu.vector_store %arg14[%c0_36, %c0_37], %48 {strides = array<i32>} : memref<1x128xf32, #tpu.memory_space<vmem>>, vector<1x128xf32>,
    return
  }
  func.func @transform_0(%arg0: i32) -> (i32, i32) {
    %c0_i32 = arith.constant 0 : i32
    %c0_i32_0 = arith.constant 0 : i32
    return %arg0, %c0_i32 : i32, i32
  }
  func.func @transform_1(%arg0: i32) -> (i32, i32) {
    %c0_i32 = arith.constant 0 : i32
    %c0_i32_0 = arith.constant 0 : i32
    %c0_i32_1 = arith.constant 0 : i32
    return %c0_i32, %c0_i32_0 : i32, i32
  }
  func.func @transform_2(%arg0: i32) -> (i32, i32) {
    %c0_i32 = arith.constant 0 : i32
    %c0_i32_0 = arith.constant 0 : i32
    %c0_i32_1 = arith.constant 0 : i32
    return %c0_i32, %c0_i32_0 : i32, i32
  }
  func.func @transform_3(%arg0: i32) -> (i32, i32) {
    %c0_i32 = arith.constant 0 : i32
    %c0_i32_0 = arith.constant 0 : i32
    %c0_i32_1 = arith.constant 0 : i32
    return %c0_i32, %c0_i32_0 : i32, i32
  }
  func.func @transform_4(%arg0: i32) -> (i32, i32) {
    %c0_i32 = arith.constant 0 : i32
    %c0_i32_0 = arith.constant 0 : i32
    %c0_i32_1 = arith.constant 0 : i32
    return %c0_i32, %c0_i32_0 : i32, i32
  }
  func.func @transform_5(%arg0: i32) -> (i32, i32) {
    %c0_i32 = arith.constant 0 : i32
    %c0_i32_0 = arith.constant 0 : i32
    %c0_i32_1 = arith.constant 0 : i32
    return %c0_i32, %c0_i32_0 : i32, i32
  }
  func.func @transform_6(%arg0: i32) -> (i32, i32) {
    %c0_i32 = arith.constant 0 : i32
    %c0_i32_0 = arith.constant 0 : i32
    %c0_i32_1 = arith.constant 0 : i32
    return %c0_i32, %c0_i32_0 : i32, i32
  }
  func.func @transform_7(%arg0: i32) -> (i32, i32) {
    %c0_i32 = arith.constant 0 : i32
    %c0_i32_0 = arith.constant 0 : i32
    %c0_i32_1 = arith.constant 0 : i32
    return %c0_i32, %c0_i32_0 : i32, i32
  }
  func.func @transform_8(%arg0: i32) -> (i32, i32) {
    %c0_i32 = arith.constant 0 : i32
    %c0_i32_0 = arith.constant 0 : i32
    %c0_i32_1 = arith.constant 0 : i32
    return %c0_i32, %c0_i32_0 : i32, i32
  }
  func.func @transform_9(%arg0: i32) -> (i32, i32) {
    %c0_i32 = arith.constant 0 : i32
    %c0_i32_0 = arith.constant 0 : i32
    %c0_i32_1 = arith.constant 0 : i32
    return %c0_i32, %c0_i32_0 : i32, i32
  }
  func.func @transform_10(%arg0: i32) -> (i32, i32) {
    %c0_i32 = arith.constant 0 : i32
    %c0_i32_0 = arith.constant 0 : i32
    %c0_i32_1 = arith.constant 0 : i32
    return %c0_i32, %c0_i32_0 : i32, i32
  }
  func.func @transform_11(%arg0: i32) -> (i32, i32) {
    %c0_i32 = arith.constant 0 : i32
    %c0_i32_0 = arith.constant 0 : i32
    %c0_i32_1 = arith.constant 0 : i32
    return %c0_i32, %c0_i32_0 : i32, i32
  }
  func.func @transform_12(%arg0: i32) -> (i32, i32) {
    %c0_i32 = arith.constant 0 : i32
    %c0_i32_0 = arith.constant 0 : i32
    %c0_i32_1 = arith.constant 0 : i32
    return %c0_i32, %c0_i32_0 : i32, i32
  }
  func.func @transform_13(%arg0: i32) -> (i32, i32) {
    %c0_i32 = arith.constant 0 : i32
    %c0_i32_0 = arith.constant 0 : i32
    return %c0_i32, %arg0 : i32, i32
  }
}

</mosaic_0001>

<bundles_post_ra>
// kernel: race_predictor_forward.1
= control target key start
LH: loop header
LB: loop body
LE: loop exit
PB: predicated region body
PF: predicated region fallthrough
CT: control target
= control target key end

     0   :  { %vm174_vm0 = vcmask 130048   ;;  %v875_v1 = vmov 0   ;;  %vm557_vm1 = vcmask 785408   ;;  %vm659_vm2 = vcmask 523264   ;;  %s1320_s0 = inlined_call_operand.vmem [shape: f32[128,16], index: 0, kind: input, shape index: {}]   ;;  %s1321_s2 = inlined_call_operand.vmem [shape: f32[128,1], index: 2, kind: input, shape index: {}]   ;;  %s1322_s4 = inlined_call_operand.vmem [shape: f32[96,1], index: 4, kind: input, shape index: {}]   ;;  %s1323_s1 = inlined_call_operand.vmem [shape: f32[128,16], index: 1, kind: input, shape index: {}]   ;;  %s1324_s6 = inlined_call_operand.vmem [shape: f32[64,1], index: 6, kind: input, shape index: {}]   ;;  %s1325_s8 = inlined_call_operand.vmem [shape: f32[32,1], index: 8, kind: input, shape index: {}]   ;;  %s1326_s10 = inlined_call_operand.vmem [shape: f32[16,1], index: 10, kind: input, shape index: {}]   ;;  %s1327_s12 = inlined_call_operand.<no memory space> [shape: f32[1,1], index: 12, kind: input, shape index: {}]   ;;  %s1328_s11 = inlined_call_operand.vmem [shape: f32[16,1], index: 11, kind: input, shape index: {}]   ;;  %s1329_s3 = inlined_call_operand.vmem [shape: f32[96,128], index: 3, kind: input, shape index: {}]   ;;  %s1330_s5 = inlined_call_operand.vmem [shape: f32[64,96], index: 5, kind: input, shape index: {}]   ;;  %s1331_s7 = inlined_call_operand.vmem [shape: f32[32,64], index: 7, kind: input, shape index: {}]   ;;  %s1332_s9 = inlined_call_operand.vmem [shape: f32[16,32], index: 9, kind: input, shape index: {}]   ;;  %s1333_s13 = inlined_call_operand.vmem [shape: f32[1,128], index: 13, kind: output, shape index: {}]  }
   0x1   :  { %v77_v0 = vld [vmem:[%s1320_s0 + $0x78] sm:$0xff]  ;;  %868 = vset.pattern.permute.xlu0 %v875_v1  ;;  %869 = vset.pattern.permute.xlu1 %v875_v1  ;;  %v91_v3 = vld [vmem:[%s1321_s2 + $0x68] sm:$0xff]  ;;  %v76_v4 = vld [vmem:[%s1320_s0 + $0x70] sm:$0xff]  ;;  %vm719_vm3 = vcmask 261120  }
   0x2   :  { %v93_v2 = vld [vmem:[%s1321_s2 + $0x78] sm:$0xff]  ;;  %804 = vmatpush.xpose.msk.msra.mxu0 %vm174_vm0, %v77_v0  ;;  %851 = vmatpush.xpose.msk.msra.mxu3 %vm174_vm0, %v77_v0  ;;  %v75_v6 = vld [vmem:[%s1320_s0 + $0x68] sm:$0xff]  ;;  %v92_v7 = vld [vmem:[%s1321_s2 + $0x70] sm:$0xff] }
   0x3   :  { %171 = vperm.xlu0 %868, %v93_v2   ;;  %161 = vperm.xlu1 %869, %v91_v3   ;;  %v89_v5 = vld [vmem:[%s1321_s2 + $0x58] sm:$0xff]  ;;  %v90_v8 = vld [vmem:[%s1321_s2 + $0x60] sm:$0xff]  ;;  %v88_v10 = vld [vmem:[%s1321_s2 + $0x50] sm:$0xff] }
   0x4   :  { %870 = vset.pattern.permute.xlu2 %v875_v1  ;;  %v74_v9 = vld [vmem:[%s1320_s0 + $0x60] sm:$0xff]  ;;  %v73_v11 = vld [vmem:[%s1320_s0 + $0x58] sm:$0xff]  ;;  %v87_v12 = vld [vmem:[%s1321_s2 + $0x48] sm:$0xff] }
   0x5   :  { %151 = vperm.xlu2 %870, %v89_v5   ;;  %v86_v13 = vld [vmem:[%s1321_s2 + $0x40] sm:$0xff]  ;;  %v72_v14 = vld [vmem:[%s1320_s0 + $0x50] sm:$0xff]  ;;  %v85_v15 = vld [vmem:[%s1321_s2 + $0x38] sm:$0xff] }
   0x6   :  { %805 = vmatpush.xpose.msk.msra.mxu0 %vm174_vm0, %v76_v4  ;;  %852 = vmatpush.xpose.msk.msra.mxu3 %vm174_vm0, %v76_v4  ;;  %v71_v16 = vld [vmem:[%s1320_s0 + $0x48] sm:$0xff]  ;;  %v84_v17 = vld [vmem:[%s1321_s2 + $0x30] sm:$0xff]  ;;  %v70_v19 = vld [vmem:[%s1320_s0 + $0x40] sm:$0xff] }
   0x7   :  { %v83_v18 = vld [vmem:[%s1321_s2 + $0x28] sm:$0xff]  ;;  %v82_v20 = vld [vmem:[%s1321_s2 + $0x20] sm:$0xff]  ;;  %v69_v21 = vld [vmem:[%s1320_s0 + $0x38] sm:$0xff] }
   0x8   :  { %v81_v22 = vld [vmem:[%s1321_s2 + $0x18] sm:$0xff]  ;;  %v80_v23 = vld [vmem:[%s1321_s2 + $0x10] sm:$0xff]  ;;  %v79_v25 = vld [vmem:[%s1321_s2 + $0x8] sm:$0xff] }
   0x9   :  { %v68_v24 = vld [vmem:[%s1320_s0 + $0x30] sm:$0xff]  ;;  %v67_v26 = vld [vmem:[%s1320_s0 + $0x28] sm:$0xff]  ;;  %v78_v27 = vld [vmem:[%s1321_s2] sm:$0xff] }
   0xa   :  { %806 = vmatpush.xpose.msk.msra.mxu0 %vm174_vm0, %v75_v6  ;;  %853 = vmatpush.xpose.msk.msra.mxu3 %vm174_vm0, %v75_v6  ;;  %v375_v28 = vld [vmem:[%s1322_s4 + $0x58] sm:$0xff]  ;;  %v66_v29 = vld [vmem:[%s1320_s0 + $0x20] sm:$0xff]  ;;  %v374_v30 = vld [vmem:[%s1322_s4 + $0x50] sm:$0xff] }
   0xb   :  { %166 = vperm.xlu0 %868, %v92_v7   ;;  %156 = vperm.xlu1 %869, %v90_v8   ;;  %v65_v31 = vld [vmem:[%s1320_s0 + $0x18] sm:$0xff]  ;;  %v373_v32 = vld [vmem:[%s1322_s4 + $0x48] sm:$0xff]  ;;  %v372_v33 = vld [vmem:[%s1322_s4 + $0x40] sm:$0xff]  ;;  %v18_v7 = vstv %s1327_s12 }
   0xc   :  { %v64_v34 = vld [vmem:[%s1320_s0 + $0x10] sm:$0xff]  ;;  %v371_v35 = vld [vmem:[%s1322_s4 + $0x38] sm:$0xff]  ;;  %v63_v36 = vld [vmem:[%s1320_s0 + $0x8] sm:$0xff]  ;;  %19 = vst [vmem:[#allocation2] sm:$0x1] %v18_v7 }
   0xd   :  { %146 = vperm.xlu2 %870, %v88_v10   ;;  %v370_v37 = vld [vmem:[%s1322_s4 + $0x30] sm:$0xff]  ;;  %v369_v38 = vld [vmem:[%s1322_s4 + $0x28] sm:$0xff]  ;;  %v62_v39 = vld [vmem:[%s1320_s0] sm:$0xff] }
   0xe   :  { %807 = vmatpush.xpose.msk.msra.mxu0 %vm174_vm0, %v74_v9  ;;  %854 = vmatpush.xpose.msk.msra.mxu3 %vm174_vm0, %v74_v9  ;;  %v368_v40 = vld [vmem:[%s1322_s4 + $0x20] sm:$0xff]  ;;  %v55_v42 = vld [vmem:[%s1323_s1 + $0x48] sm:$0xff]  ;;  %v367_v43 = vld [vmem:[%s1322_s4 + $0x18] sm:$0xff] }
   0xf   :  { %v46_v41 = vld [vmem:[%s1323_s1] sm:$0xff]  ;;  %v366_v44 = vld [vmem:[%s1322_s4 + $0x10] sm:$0xff]  ;;  %v365_v45 = vld [vmem:[%s1322_s4 + $0x8] sm:$0xff] }
  0x10   :  { %v47_v46 = vld [vmem:[%s1323_s1 + $0x8] sm:$0xff]  ;;  %v56_v47 = vld [vmem:[%s1323_s1 + $0x50] sm:$0xff]  ;;  %v364_v48 = vld [vmem:[%s1322_s4] sm:$0xff] }
  0x11   :  { %v516_v49 = vld [vmem:[%s1324_s6 + $0x38] sm:$0xff]  ;;  %v515_v50 = vld [vmem:[%s1324_s6 + $0x30] sm:$0xff]  ;;  %v514_v53 = vld [vmem:[%s1324_s6 + $0x28] sm:$0xff] }
  0x12   :  { %808 = vmatpush.xpose.msk.msra.mxu0 %vm174_vm0, %v73_v11  ;;  %855 = vmatpush.xpose.msk.msra.mxu3 %vm174_vm0, %v73_v11  ;;  %v48_v51 = vld [vmem:[%s1323_s1 + $0x10] sm:$0xff]  ;;  %v57_v52 = vld [vmem:[%s1323_s1 + $0x58] sm:$0xff]  ;;  %v513_v54 = vld [vmem:[%s1324_s6 + $0x20] sm:$0xff] }
  0x13   :  { %141 = vperm.xlu0 %868, %v87_v12   ;;  %136 = vperm.xlu1 %869, %v86_v13   ;;  %v512_v55 = vld [vmem:[%s1324_s6 + $0x18] sm:$0xff]  ;;  %v58_v57 = vld [vmem:[%s1323_s1 + $0x60] sm:$0xff]  ;;  %v511_v58 = vld [vmem:[%s1324_s6 + $0x10] sm:$0xff] }
  0x14   :  { %v49_v56 = vld [vmem:[%s1323_s1 + $0x18] sm:$0xff]  ;;  %v510_v59 = vld [vmem:[%s1324_s6 + $0x8] sm:$0xff]  ;;  %v509_v60 = vld [vmem:[%s1324_s6] sm:$0xff] }
  0x15   :  { %131 = vperm.xlu2 %870, %v85_v15   ;;  %v50_v61 = vld [vmem:[%s1323_s1 + $0x20] sm:$0xff]  ;;  %v59_v62 = vld [vmem:[%s1323_s1 + $0x68] sm:$0xff]  ;;  %v638_v63 = vld [vmem:[%s1325_s8 + $0x18] sm:$0xff] }
  0x16   :  { %809 = vmatpush.xpose.msk.msra.mxu0 %vm174_vm0, %v72_v14  ;;  %856 = vmatpush.xpose.msk.msra.mxu3 %vm174_vm0, %v72_v14  ;;  %v637_v0 = vld [vmem:[%s1325_s8 + $0x10] sm:$0xff]  ;;  %v636_v1 = vld [vmem:[%s1325_s8 + $0x8] sm:$0xff]  ;;  %v635_v4 = vld [vmem:[%s1325_s8] sm:$0xff] }
  0x17   :  { %v51_v2 = vld [vmem:[%s1323_s1 + $0x28] sm:$0xff]  ;;  %v60_v3 = vld [vmem:[%s1323_s1 + $0x70] sm:$0xff]  ;;  %v707_v5 = vld [vmem:[%s1326_s10] sm:$0xff] }
  0x18   :  { %v708_v6 = vld [vmem:[%s1326_s10 + $0x8] sm:$0xff]  ;;  %v52_v8 = vld [vmem:[%s1323_s1 + $0x30] sm:$0xff]  ;;  %v61_v9 = vld [vmem:[%s1323_s1 + $0x78] sm:$0xff] }
  0x19   :  { %v751_v10 = vld [vmem:[%s1328_s11] sm:$0xff]  ;;  %v752_v11 = vld [vmem:[%s1328_s11 + $0x8] sm:$0xff]  ;;  %v53_v13 = vld [vmem:[%s1323_s1 + $0x38] sm:$0xff] }
  0x1a   :  { %810 = vmatpush.xpose.msk.msra.mxu0 %vm174_vm0, %v71_v16  ;;  %857 = vmatpush.xpose.msk.msra.mxu3 %vm174_vm0, %v71_v16  ;;  %v772_v12 = vld [vmem:[#allocation2] sm:$0x1] }
  0x1b   :  { %126 = vperm.xlu0 %868, %v84_v17   ;;  %121 = vperm.xlu1 %869, %v83_v18   ;;  %v54_v14 = vld [vmem:[%s1323_s1 + $0x40] sm:$0xff] }
  0x1d   :  { %116 = vperm.xlu2 %870, %v82_v20  }
  0x1e   :  { %811 = vmatpush.xpose.msk.msra.mxu0 %vm174_vm0, %v70_v19  ;;  %858 = vmatpush.xpose.msk.msra.mxu3 %vm174_vm0, %v70_v19 }
  0x22   :  { %812 = vmatpush.xpose.msk.msra.mxu0 %vm174_vm0, %v69_v21  ;;  %859 = vmatpush.xpose.msk.msra.mxu3 %vm174_vm0, %v69_v21 }
  0x23   :  { %111 = vperm.xlu0 %868, %v81_v22   ;;  %106 = vperm.xlu1 %869, %v80_v23  }
  0x25   :  { %101 = vperm.xlu2 %870, %v79_v25  }
  0x26   :  { %813 = vmatpush.xpose.msk.msra.mxu0 %vm174_vm0, %v68_v24  ;;  %860 = vmatpush.xpose.msk.msra.mxu3 %vm174_vm0, %v68_v24 }
  0x2a   :  { %814 = vmatpush.xpose.msk.msra.mxu0 %vm174_vm0, %v67_v26  ;;  %861 = vmatpush.xpose.msk.msra.mxu3 %vm174_vm0, %v67_v26 }
  0x2b   :  { %96 = vperm.xlu0 %868, %v78_v27   ;;  %433 = vperm.xlu1 %869, %v375_v28  }
  0x2d   :  { %428 = vperm.xlu2 %870, %v374_v30  }
  0x2e   :  { %815 = vmatpush.xpose.msk.msra.mxu0 %vm174_vm0, %v66_v29  ;;  %862 = vmatpush.xpose.msk.msra.mxu3 %vm174_vm0, %v66_v29 }
  0x32   :  { %816 = vmatpush.xpose.msk.msra.mxu0 %vm174_vm0, %v65_v31  ;;  %863 = vmatpush.xpose.msk.msra.mxu3 %vm174_vm0, %v65_v31 }
  0x33   :  { %423 = vperm.xlu0 %868, %v373_v32   ;;  %418 = vperm.xlu1 %869, %v372_v33  }
  0x35   :  { %413 = vperm.xlu2 %870, %v371_v35  }
  0x36   :  { %817 = vmatpush.xpose.msk.msra.mxu0 %vm174_vm0, %v64_v34  ;;  %864 = vmatpush.xpose.msk.msra.mxu3 %vm174_vm0, %v64_v34 }
  0x3a   :  { %818 = vmatpush.xpose.msk.msra.mxu0 %vm174_vm0, %v63_v36  ;;  %865 = vmatpush.xpose.msk.msra.mxu3 %vm174_vm0, %v63_v36 }
  0x3b   :  { %408 = vperm.xlu0 %868, %v370_v37   ;;  %403 = vperm.xlu1 %869, %v369_v38  }
  0x3d   :  { %398 = vperm.xlu2 %870, %v368_v40  }
  0x3e   :  { %819 = vmatpush.xpose.msk.msra.mxu0 %vm174_vm0, %v62_v39  ;;  %866 = vmatpush.xpose.msk.msra.mxu3 %vm174_vm0, %v62_v39 }
  0x41   :  { %820 = vmatmul.msk.f32.vlgmr.msra.gmra.mxu0 %vm174_vm0, %v46_v41  ;;  %829 = vmatmul.msk.f32.vlgmr.msra.gmra.mxu3 %vm174_vm0, %v55_v42 }
  0x43   :  { %393 = vperm.xlu0 %868, %v367_v43   ;;  %388 = vperm.xlu1 %869, %v366_v44  }
  0x45   :  { %383 = vperm.xlu2 %870, %v365_v45  }
  0x49   :  { %821 = vmatmul.msk.f32.gmra.mxu0 %vm174_vm0, %v47_v46  ;;  %830 = vmatmul.msk.f32.gmra.mxu3 %vm174_vm0, %v56_v47 }
  0x4b   :  { %378 = vperm.xlu0 %868, %v364_v48   ;;  %554 = vperm.xlu1 %869, %v516_v49  }
  0x4d   :  { %549 = vperm.xlu2 %870, %v515_v50  }
  0x51   :  { %822 = vmatmul.msk.f32.gmra.mxu0 %vm174_vm0, %v48_v51  ;;  %831 = vmatmul.msk.f32.gmra.mxu3 %vm174_vm0, %v57_v52 }
  0x53   :  { %544 = vperm.xlu0 %868, %v514_v53   ;;  %539 = vperm.xlu1 %869, %v513_v54  }
  0x55   :  { %534 = vperm.xlu2 %870, %v512_v55  }
  0x59   :  { %823 = vmatmul.msk.f32.gmra.mxu0 %vm174_vm0, %v49_v56  ;;  %832 = vmatmul.msk.f32.gmra.mxu3 %vm174_vm0, %v58_v57 }
  0x5b   :  { %529 = vperm.xlu0 %868, %v511_v58   ;;  %524 = vperm.xlu1 %869, %v510_v59  }
  0x5d   :  { %519 = vperm.xlu2 %870, %v509_v60  }
  0x5f   :  { %v152_v27 = vpop.permute.xlu2 %151 }
  0x61   :  { %824 = vmatmul.msk.f32.gmra.mxu0 %vm174_vm0, %v50_v61  ;;  %833 = vmatmul.msk.f32.gmra.mxu3 %vm174_vm0, %v59_v62 }
  0x63   :  { %656 = vperm.xlu0 %868, %v638_v63   ;;  %651 = vperm.xlu1 %869, %v637_v0  }
  0x65   :  { %646 = vperm.xlu2 %870, %v636_v1  }
  0x67   :  { %v147_v33 = vpop.permute.xlu2 %146 }
  0x69   :  { %825 = vmatmul.msk.f32.gmra.mxu0 %vm174_vm0, %v51_v2  ;;  %834 = vmatmul.msk.f32.gmra.mxu3 %vm174_vm0, %v60_v3 }
  0x6b   :  { %641 = vperm.xlu0 %868, %v635_v4   ;;  %711 = vperm.xlu1 %869, %v707_v5  }
  0x6d   :  { %716 = vperm.xlu2 %870, %v708_v6  }
  0x6f   :  { %v132_v44 = vpop.permute.xlu2 %131 }
  0x71   :  { %826 = vmatmul.msk.f32.gmra.mxu0 %vm174_vm0, %v52_v8  ;;  %835 = vmatmul.msk.f32.gmra.mxu3 %vm174_vm0, %v61_v9 }
  0x73   :  { %755 = vperm.xlu0 %868, %v751_v10   ;;  %760 = vperm.xlu1 %869, %v752_v11  }
  0x75   :  { %775 = vperm.xlu2 %870, %v772_v12   ;;  %v172_v23 = vpop.permute.xlu0 %171  ;;  %v162_v25 = vpop.permute.xlu1 %161 }
  0x77   :  { %v117_v58 = vpop.permute.xlu2 %116 }
  0x79   :  { %827 = vmatmul.msk.f32.gmra.mxu0 %vm174_vm0, %v53_v13 }
  0x7d   :  { %v167_v29 = vpop.permute.xlu0 %166  ;;  %v157_v31 = vpop.permute.xlu1 %156 }
  0x7f   :  { %v102_v7 = vpop.permute.xlu2 %101 }
  0x81   :  { %828 = vmatmul.msk.f32.gmra.mxu0 %vm174_vm0, %v54_v14 }
  0x85   :  { %v142_v34 = vpop.permute.xlu0 %141  ;;  %v137_v41 = vpop.permute.xlu1 %136 }
  0x8d   :  { %v127_v47 = vpop.permute.xlu0 %126  ;;  %v122_v55 = vpop.permute.xlu1 %121 }
  0x95   :  { %v112_v61 = vpop.permute.xlu0 %111  ;;  %v107_v4 = vpop.permute.xlu1 %106 }
  0x9d   :  { %v97_v10 = vpop.permute.xlu0 %96 }
  0xbe   :  { %v1225_v15 = vpop.f32.mrf.mxu0 }
  0xbf   :  { %v289_v11 = vadd.f32 %v1225_v15, %v97_v10  ;;  %v354_v15 = vld [vmem:[%s1329_s3 + $0x10] sm:$0xff] }
  0xc1   :  { %v336_v14 = vmax.f32 %v289_v11, 0.0  ;;  %v501_v11 = vld [vmem:[%s1330_s5] sm:$0xff] }
  0xc4   :  { %v315_v16 = vpop.f32.mrf.mxu3 }
  0xc5   :  { %v316_v51 = vadd.f32 %v315_v16, %v142_v34  ;;  %v352_v16 = vld [vmem:[%s1329_s3] sm:$0xff] }
  0xc6   :  { %v1227_v17 = vpop.f32.mrf.mxu0 }
  0xc7   :  { %v345_v56 = vmax.f32 %v316_v51, 0.0  ;;  %v292_v8 = vadd.f32 %v1227_v17, %v102_v7  ;;  %v353_v17 = vld [vmem:[%s1329_s3 + $0x8] sm:$0xff] }
  0xc9   :  { %v337_v13 = vmax.f32 %v292_v8, 0.0 }
  0xcc   :  { %v318_v18 = vpop.f32.mrf.mxu3 }
  0xcd   :  { %v319_v48 = vadd.f32 %v318_v18, %v147_v33  ;;  %v355_v18 = vld [vmem:[%s1329_s3 + $0x18] sm:$0xff] }
  0xce   :  { %v294_v19 = vpop.f32.mrf.mxu0 }
  0xcf   :  { %v346_v53 = vmax.f32 %v319_v48, 0.0  ;;  %v295_v5 = vadd.f32 %v294_v19, %v107_v4  ;;  %v356_v19 = vld [vmem:[%s1329_s3 + $0x20] sm:$0xff] }
  0xd1   :  { %v338_v12 = vmax.f32 %v295_v5, 0.0 }
  0xd4   :  { %v321_v20 = vpop.f32.mrf.mxu3 }
  0xd5   :  { %v322_v45 = vadd.f32 %v321_v20, %v152_v27  ;;  %v357_v20 = vld [vmem:[%s1329_s3 + $0x28] sm:$0xff] }
  0xd6   :  { %v297_v21 = vpop.f32.mrf.mxu0 }
  0xd7   :  { %v347_v52 = vmax.f32 %v322_v45, 0.0  ;;  %v298_v2 = vadd.f32 %v297_v21, %v112_v61  ;;  %v358_v21 = vld [vmem:[%s1329_s3 + $0x30] sm:$0xff] }
  0xd9   :  { %v339_v9 = vmax.f32 %v298_v2, 0.0 }
  0xdc   :  { %v324_v22 = vpop.f32.mrf.mxu3 }
  0xdd   :  { %v325_v42 = vadd.f32 %v324_v22, %v157_v31  ;;  %v359_v22 = vld [vmem:[%s1329_s3 + $0x38] sm:$0xff] }
  0xde   :  { %v300_v24 = vpop.f32.mrf.mxu0 }
  0xdf   :  { %v348_v49 = vmax.f32 %v325_v42, 0.0  ;;  %v301_v0 = vadd.f32 %v300_v24, %v117_v58  ;;  %v361_v24 = vld [vmem:[%s1329_s3 + $0x48] sm:$0xff] }
  0xe1   :  { %v340_v6 = vmax.f32 %v301_v0, 0.0 }
  0xe4   :  { %v327_v26 = vpop.f32.mrf.mxu3 }
  0xe5   :  { %v328_v39 = vadd.f32 %v327_v26, %v162_v25  ;;  %v362_v25 = vld [vmem:[%s1329_s3 + $0x50] sm:$0xff]  ;;  %v363_v26 = vld [vmem:[%s1329_s3 + $0x58] sm:$0xff] }
  0xe6   :  { %v303_v28 = vpop.f32.mrf.mxu0 }
  0xe7   :  { %v349_v46 = vmax.f32 %v328_v39, 0.0  ;;  %v304_v62 = vadd.f32 %v303_v28, %v122_v55  ;;  %v424_v39 = vpop.permute.xlu0 %423 }
  0xe9   :  { %v341_v3 = vmax.f32 %v304_v62, 0.0 }
  0xec   :  { %v330_v30 = vpop.f32.mrf.mxu3 }
  0xed   :  { %v331_v36 = vadd.f32 %v330_v30, %v167_v29 }
  0xee   :  { %v306_v32 = vpop.f32.mrf.mxu0 }
  0xef   :  { %v350_v43 = vmax.f32 %v331_v36, 0.0  ;;  %v307_v59 = vadd.f32 %v306_v32, %v127_v47 }
  0xf1   :  { %v342_v1 = vmax.f32 %v307_v59, 0.0 }
  0xf4   :  { %v333_v35 = vpop.f32.mrf.mxu3 }
  0xf5   :  { %v334_v37 = vadd.f32 %v333_v35, %v172_v23  ;;  %v360_v23 = vld [vmem:[%s1329_s3 + $0x40] sm:$0xff] }
  0xf6   :  { %v309_v38 = vpop.f32.mrf.mxu0 }
  0xf7   :  { %v351_v40 = vmax.f32 %v334_v37, 0.0  ;;  %v310_v57 = vadd.f32 %v309_v38, %v132_v44  ;;  %v434_v37 = vpop.permute.xlu1 %433  ;;  %v429_v38 = vpop.permute.xlu2 %428 }
  0xf9   :  { %436 = vmatpush.msra.mxu1 %v351_v40  ;;  %v343_v63 = vmax.f32 %v310_v57, 0.0 }
  0xfb   :  { %437 = vmatpush.msra.mxu1 %v350_v43  ;;  %v409_v43 = vpop.permute.xlu0 %408 }
  0xfd   :  { %438 = vmatpush.msra.mxu1 %v349_v46 }
  0xfe   :  { %v312_v50 = vpop.f32.mrf.mxu0 }
  0xff   :  { %439 = vmatpush.msra.mxu1 %v348_v49  ;;  %v313_v54 = vadd.f32 %v312_v50, %v137_v41  ;;  %v419_v41 = vpop.permute.xlu1 %418  ;;  %v414_v42 = vpop.permute.xlu2 %413 }
 0x101   :  { %440 = vmatpush.msra.mxu1 %v347_v52  ;;  %v344_v60 = vmax.f32 %v313_v54, 0.0 }
 0x103   :  { %441 = vmatpush.msra.mxu1 %v346_v53  ;;  %v394_v57 = vpop.permute.xlu0 %393 }
 0x105   :  { %442 = vmatpush.msra.mxu1 %v345_v56 }
 0x107   :  { %443 = vmatpush.msra.mxu1 %v344_v60  ;;  %v404_v51 = vpop.permute.xlu1 %403  ;;  %v399_v54 = vpop.permute.xlu2 %398 }
 0x109   :  { %444 = vmatpush.msra.mxu1 %v343_v63 }
 0x10b   :  { %445 = vmatpush.msra.mxu1 %v342_v1 }
 0x10d   :  { %446 = vmatpush.msra.mxu1 %v341_v3 }
 0x10f   :  { %447 = vmatpush.msra.mxu1 %v340_v6  ;;  %v389_v0 = vpop.permute.xlu1 %388  ;;  %v384_v3 = vpop.permute.xlu2 %383 }
 0x110   :  { %v379_v6 = vpop.permute.xlu0 %378 }
 0x111   :  { %448 = vmatpush.msra.mxu1 %v339_v9 }
 0x113   :  { %449 = vmatpush.msra.mxu1 %v338_v12  ;;  %v502_v12 = vld [vmem:[%s1330_s5 + $0x8] sm:$0xff] }
 0x115   :  { %450 = vmatpush.msra.mxu1 %v337_v13  ;;  %v503_v13 = vld [vmem:[%s1330_s5 + $0x10] sm:$0xff] }
 0x117   :  { %451 = vmatpush.msra.mxu1 %v336_v14  ;;  %v504_v14 = vld [vmem:[%s1330_s5 + $0x18] sm:$0xff] }
 0x118   :  { %452 = vmatmul.f32.vlgmr.msra.gmra.mxu1 %v352_v16  ;;  %v505_v16 = vld [vmem:[%s1330_s5 + $0x20] sm:$0xff] }
 0x120   :  { %455 = vmatmul.f32.gmra.mxu1 %v353_v17  ;;  %v506_v17 = vld [vmem:[%s1330_s5 + $0x28] sm:$0xff] }
 0x128   :  { %458 = vmatmul.f32.gmra.mxu1 %v354_v15  ;;  %v507_v15 = vld [vmem:[%s1330_s5 + $0x30] sm:$0xff] }
 0x130   :  { %461 = vmatmul.f32.gmra.mxu1 %v355_v18  ;;  %v508_v18 = vld [vmem:[%s1330_s5 + $0x38] sm:$0xff] }
 0x138   :  { %464 = vmatmul.f32.gmra.mxu1 %v356_v19 }
 0x140   :  { %467 = vmatmul.f32.gmra.mxu1 %v357_v20 }
 0x148   :  { %470 = vmatmul.f32.gmra.mxu1 %v358_v21 }
 0x150   :  { %473 = vmatmul.f32.gmra.mxu1 %v359_v22 }
 0x158   :  { %476 = vmatmul.f32.gmra.mxu1 %v360_v23 }
 0x160   :  { %479 = vmatmul.f32.gmra.mxu1 %v361_v24 }
 0x168   :  { %482 = vmatmul.f32.gmra.mxu1 %v362_v25  ;;  %v555_v25 = vpop.permute.xlu1 %554 }
 0x170   :  { %485 = vmatmul.f32.gmra.mxu1 %v363_v26  ;;  %v550_v26 = vpop.permute.xlu2 %549 }
 0x195   :  { %v453_v27 = vpop.f32.mrf.mxu1 }
 0x196   :  { %v454_v7 = vadd.f32 %v453_v27, %v379_v6 }
 0x198   :  { %v489_v10 = vmax.f32 %v454_v7, 0.0  ;;  %v705_v7 = vld [vmem:[%s1332_s9] sm:$0xff] }
 0x19d   :  { %v456_v28 = vpop.f32.mrf.mxu1 }
 0x19e   :  { %v457_v4 = vadd.f32 %v456_v28, %v384_v3  ;;  %v545_v28 = vpop.permute.xlu0 %544 }
 0x1a0   :  { %v490_v9 = vmax.f32 %v457_v4, 0.0 }
 0x1a5   :  { %v459_v29 = vpop.f32.mrf.mxu1 }
 0x1a6   :  { %v460_v1 = vadd.f32 %v459_v29, %v389_v0  ;;  %v540_v29 = vpop.permute.xlu1 %539 }
 0x1a8   :  { %v491_v8 = vmax.f32 %v460_v1, 0.0 }
 0x1ad   :  { %v462_v30 = vpop.f32.mrf.mxu1 }
 0x1ae   :  { %v463_v62 = vadd.f32 %v462_v30, %v394_v57 }
 0x1b0   :  { %v492_v5 = vmax.f32 %v463_v62, 0.0 }
 0x1b5   :  { %v465_v31 = vpop.f32.mrf.mxu1 }
 0x1b6   :  { %v466_v60 = vadd.f32 %v465_v31, %v399_v54  ;;  %v634_v54 = vld [vmem:[%s1331_s7 + $0x18] sm:$0xff] }
 0x1b8   :  { %v493_v2 = vmax.f32 %v466_v60, 0.0 }
 0x1bd   :  { %v468_v32 = vpop.f32.mrf.mxu1 }
 0x1be   :  { %v469_v58 = vadd.f32 %v468_v32, %v404_v51  ;;  %v631_v51 = vld [vmem:[%s1331_s7] sm:$0xff] }
 0x1c0   :  { %v494_v63 = vmax.f32 %v469_v58, 0.0 }
 0x1c5   :  { %v471_v33 = vpop.f32.mrf.mxu1 }
 0x1c6   :  { %v472_v55 = vadd.f32 %v471_v33, %v409_v43  ;;  %v535_v33 = vpop.permute.xlu2 %534  ;;  %v525_v43 = vpop.permute.xlu1 %524 }
 0x1c8   :  { %v495_v61 = vmax.f32 %v472_v55, 0.0 }
 0x1cd   :  { %v474_v34 = vpop.f32.mrf.mxu1 }
 0x1ce   :  { %v475_v52 = vadd.f32 %v474_v34, %v414_v42 }
 0x1d0   :  { %v496_v59 = vmax.f32 %v475_v52, 0.0  ;;  %v632_v52 = vld [vmem:[%s1331_s7 + $0x8] sm:$0xff] }
 0x1d5   :  { %v477_v35 = vpop.f32.mrf.mxu1 }
 0x1d6   :  { %v478_v49 = vadd.f32 %v477_v35, %v419_v41 }
 0x1d8   :  { %v497_v56 = vmax.f32 %v478_v49, 0.0 }
 0x1dd   :  { %v480_v36 = vpop.f32.mrf.mxu1 }
 0x1de   :  { %v481_v47 = vadd.f32 %v480_v36, %v424_v39 }
 0x1e0   :  { %v498_v53 = vmax.f32 %v481_v47, 0.0 }
 0x1e5   :  { %v483_v40 = vpop.f32.mrf.mxu1 }
 0x1e6   :  { %v484_v45 = vadd.f32 %v483_v40, %v429_v38  ;;  %v530_v40 = vpop.permute.xlu0 %529 }
 0x1e8   :  { %v499_v50 = vmax.f32 %v484_v45, 0.0 }
 0x1ed   :  { %v486_v44 = vpop.f32.mrf.mxu1 }
 0x1ee   :  { %v487_v46 = vadd.f32 %v486_v44, %v434_v37  ;;  %v657_v58 = vpop.permute.xlu0 %656 }
 0x1f0   :  { %v500_v48 = vmax.f32 %v487_v46, 0.0  ;;  %v520_v46 = vpop.permute.xlu2 %519 }
 0x1f2   :  { %586 = vmatpush.msra.mxu2 %v500_v48 }
 0x1f4   :  { %587 = vmatpush.msra.mxu2 %v499_v50 }
 0x1f6   :  { %588 = vmatpush.msra.mxu2 %v498_v53  ;;  %v633_v53 = vld [vmem:[%s1331_s7 + $0x10] sm:$0xff] }
 0x1f8   :  { %589 = vmatpush.msra.mxu2 %v497_v56 }
 0x1fa   :  { %590 = vmatpush.msra.mxu2 %v496_v59  ;;  %v652_v59 = vpop.permute.xlu1 %651 }
 0x1fc   :  { %591 = vmatpush.msra.mxu2 %v495_v61 }
 0x1fe   :  { %592 = vmatpush.msra.mxu2 %v494_v63  ;;  %v647_v63 = vpop.permute.xlu2 %646 }
 0x200   :  { %593 = vmatpush.msra.mxu2 %v493_v2  ;;  %v642_v2 = vpop.permute.xlu0 %641 }
 0x202   :  { %594 = vmatpush.msra.mxu2 %v492_v5 }
 0x204   :  { %595 = vmatpush.msra.mxu2 %v491_v8  ;;  %v706_v8 = vld [vmem:[%s1332_s9 + $0x8] sm:$0xff] }
 0x206   :  { %596 = vmatpush.msra.mxu2 %v490_v9 }
 0x208   :  { %597 = vmatpush.msra.mxu2 %v489_v10  ;;  %v712_v10 = vpop.permute.xlu1 %711 }
 0x209   :  { %836 = vmatmul.msk.f32.vlgmr.msra.gmra.mxu2 %vm557_vm1, %v501_v11 }
 0x211   :  { %837 = vmatmul.msk.f32.gmra.mxu2 %vm557_vm1, %v502_v12  ;;  %v717_v12 = vpop.permute.xlu2 %716 }
 0x219   :  { %838 = vmatmul.msk.f32.gmra.mxu2 %vm557_vm1, %v503_v13 }
 0x221   :  { %839 = vmatmul.msk.f32.gmra.mxu2 %vm557_vm1, %v504_v14 }
 0x229   :  { %840 = vmatmul.msk.f32.gmra.mxu2 %vm557_vm1, %v505_v16 }
 0x231   :  { %841 = vmatmul.msk.f32.gmra.mxu2 %vm557_vm1, %v506_v17 }
 0x239   :  { %842 = vmatmul.msk.f32.gmra.mxu2 %vm557_vm1, %v507_v15  ;;  %v756_v15 = vpop.permute.xlu0 %755 }
 0x241   :  { %843 = vmatmul.msk.f32.gmra.mxu2 %vm557_vm1, %v508_v18  ;;  %v761_v18 = vpop.permute.xlu1 %760 }
 0x28c   :  { %v599_v19 = vpop.f32.mrf.mxu2 }
 0x28d   :  { %v600_v47 = vadd.f32 %v599_v19, %v520_v46 }
 0x28f   :  { %v623_v50 = vmax.f32 %v600_v47, 0.0 }
 0x294   :  { %v602_v20 = vpop.f32.mrf.mxu2 }
 0x295   :  { %v603_v44 = vadd.f32 %v602_v20, %v525_v43 }
 0x297   :  { %v624_v49 = vmax.f32 %v603_v44, 0.0 }
 0x29c   :  { %v605_v21 = vpop.f32.mrf.mxu2 }
 0x29d   :  { %v606_v41 = vadd.f32 %v605_v21, %v530_v40 }
 0x29f   :  { %v625_v48 = vmax.f32 %v606_v41, 0.0 }
 0x2a4   :  { %v608_v22 = vpop.f32.mrf.mxu2 }
 0x2a5   :  { %v609_v38 = vadd.f32 %v608_v22, %v535_v33 }
 0x2a7   :  { %v626_v45 = vmax.f32 %v609_v38, 0.0 }
 0x2ac   :  { %v611_v23 = vpop.f32.mrf.mxu2 }
 0x2ad   :  { %v612_v36 = vadd.f32 %v611_v23, %v540_v29 }
 0x2af   :  { %v627_v42 = vmax.f32 %v612_v36, 0.0 }
 0x2b4   :  { %v614_v24 = vpop.f32.mrf.mxu2 }
 0x2b5   :  { %v615_v34 = vadd.f32 %v614_v24, %v545_v28 }
 0x2b7   :  { %v628_v39 = vmax.f32 %v615_v34, 0.0 }
 0x2bc   :  { %v617_v27 = vpop.f32.mrf.mxu2 }
 0x2bd   :  { %v618_v31 = vadd.f32 %v617_v27, %v550_v26  ;;  %v776_v26 = vpop.permute.xlu2 %775 }
 0x2be   :  { %v778_v28 = vperm.slane %v776_v26, 0 }
 0x2bf   :  { %v629_v37 = vmax.f32 %v618_v31, 0.0 }
 0x2c4   :  { %v620_v30 = vpop.f32.mrf.mxu2 }
 0x2c5   :  { %v621_v32 = vadd.f32 %v620_v30, %v555_v25 }
 0x2c7   :  { %v630_v35 = vmax.f32 %v621_v32, 0.0 }
 0x2c9   :  { %680 = vmatpush.msrb.mxu2 %v630_v35 }
 0x2cb   :  { %681 = vmatpush.msrb.mxu2 %v629_v37 }
 0x2cd   :  { %682 = vmatpush.msrb.mxu2 %v628_v39 }
 0x2cf   :  { %683 = vmatpush.msrb.mxu2 %v627_v42 }
 0x2d1   :  { %684 = vmatpush.msrb.mxu2 %v626_v45 }
 0x2d3   :  { %685 = vmatpush.msrb.mxu2 %v625_v48 }
 0x2d5   :  { %686 = vmatpush.msrb.mxu2 %v624_v49 }
 0x2d7   :  { %687 = vmatpush.msrb.mxu2 %v623_v50 }
 0x2d8   :  { %844 = vmatmul.msk.f32.vlgmr.msrb.gmra.mxu2 %vm659_vm2, %v631_v51 }
 0x2e0   :  { %845 = vmatmul.msk.f32.gmra.mxu2 %vm659_vm2, %v632_v52 }
 0x2e8   :  { %846 = vmatmul.msk.f32.gmra.mxu2 %vm659_vm2, %v633_v53 }
 0x2f0   :  { %847 = vmatmul.msk.f32.gmra.mxu2 %vm659_vm2, %v634_v54 }
 0x35b   :  { %v689_v55 = vpop.f32.mrf.mxu2 }
 0x35c   :  { %v690_v3 = vadd.f32 %v689_v55, %v642_v2 }
 0x35e   :  { %v701_v6 = vmax.f32 %v690_v3, 0.0 }
 0x363   :  { %v692_v56 = vpop.f32.mrf.mxu2 }
 0x364   :  { %v693_v0 = vadd.f32 %v692_v56, %v647_v63 }
 0x366   :  { %v702_v5 = vmax.f32 %v693_v0, 0.0 }
 0x36b   :  { %v695_v57 = vpop.f32.mrf.mxu2 }
 0x36c   :  { %v696_v61 = vadd.f32 %v695_v57, %v652_v59 }
 0x36e   :  { %v703_v4 = vmax.f32 %v696_v61, 0.0 }
 0x373   :  { %v698_v60 = vpop.f32.mrf.mxu2 }
 0x374   :  { %v699_v62 = vadd.f32 %v698_v60, %v657_v58 }
 0x376   :  { %v704_v1 = vmax.f32 %v699_v62, 0.0 }
 0x378   :  { %738 = vmatpush.msrb.mxu3 %v704_v1 }
 0x37a   :  { %739 = vmatpush.msrb.mxu3 %v703_v4 }
 0x37c   :  { %740 = vmatpush.msrb.mxu3 %v702_v5 }
 0x37e   :  { %741 = vmatpush.msrb.mxu3 %v701_v6 }
 0x37f   :  { %848 = vmatmul.msk.f32.vlgmr.msrb.gmra.mxu3 %vm719_vm3, %v705_v7 }
 0x387   :  { %849 = vmatmul.msk.f32.gmra.mxu3 %vm719_vm3, %v706_v8 }
 0x402   :  { %v743_v9 = vpop.f32.mrf.mxu3 }
 0x403   :  { %v744_v11 = vadd.f32 %v743_v9, %v712_v10 }
 0x405   :  { %v749_v14 = vmax.f32 %v744_v11, 0.0 }
 0x407   :  { %v763_v19 = vmul.f32 %v756_v15, %v749_v14 }
 0x40a   :  { %v746_v13 = vpop.f32.mrf.mxu3 }
 0x40b   :  { %v747_v16 = vadd.f32 %v746_v13, %v717_v12 }
 0x40d   :  { %v750_v17 = vmax.f32 %v747_v16, 0.0 }
 0x40f   :  { %v764_v20 = vmul.f32 %v761_v18, %v750_v17 }
 0x411   :  { %v765_v21 = vadd.f32 %v764_v20, %v763_v19 }
 0x413   :  { %v766_v22 = vrot.slane %v765_v21, 4 }
 0x415   :  { %v767_v23 = vadd.f32 %v766_v22, %v765_v21 }
 0x417   :  { %v768_v24 = vrot.slane %v767_v23, 2 }
 0x419   :  { %v769_v25 = vadd.f32 %v768_v24, %v767_v23 }
 0x41b   :  { %v770_v27 = vrot.slane %v769_v25, 1 }
 0x41d   :  { %v771_v29 = vadd.f32 %v770_v27, %v769_v25 }
 0x41f   :  { %v779_v30 = vadd.f32 %v778_v28, %v771_v29 }
 0x421   :  { %v850_v31 = vmul.f32 -1.442695, %v779_v30 }
 0x423   :  { %871 = vpow2.f32 %v850_v31 }
 0x429   :  { %v872_v32 = vpop.eup %871 }
 0x42a   :  { %v783_v33 = vadd.f32 1.0, %v872_v32 }
 0x42c   :  { %873 = vrcp.f32 %v783_v33  ;;  %v795_v37 = vand.u32 2147483648, %v783_v33  ;;  %v793_v39 = vand.u32 2147483647, %v783_v33  ;;  %vm789_vm5 = vweird.f32 %v783_v33 }
 0x42e   :  { %v796_v41 = vor.u32 1.1754944e-38, %v795_v37  ;;  %vm794_vm7 = vcmp.eq.f32.partialorder %v793_v39, 8.507059e+37 }
 0x432   :  { %v874_v34 = vpop.eup %873 }
 0x433   :  { %v785_v35 = vmul.f32 %v874_v34, %v783_v33  ;;  %vm790_vm4 = vweird.f32 %v874_v34 }
 0x434   :  { %vm791_vm6 = vmor %vm789_vm5, %vm790_vm4 }
 0x435   :  { %v786_v36 = vsub.f32 1.0, %v785_v35 }
 0x437   :  { %v787_v38 = vmul.f32 %v874_v34, %v786_v36 }
 0x439   :  { %v788_v40 = vadd.f32 %v874_v34, %v787_v38 }
 0x43b   :  { %v792_v42 = vsel %vm791_vm6, %v874_v34, %v788_v40 }
 0x43c   :  { %v797_v43 = vsel %vm794_vm7, %v796_v41, %v792_v42 }
 0x43d   :  { %799 = vst [vmem:[%s1333_s13] sm:$0x1] %v797_v43 }

</bundles_post_ra>
